<compile_context>
chip_gen: v6e
topology: v6e:2x2x1
jax: 0.10.0
libtpu: 0.0.40
codegen_flags: <defaults>
</compile_context>

<pallas_src>
import functools

import jax
import jax.numpy as jnp
from jax.experimental import pallas as pl
from jax.experimental.pallas import tpu as pltpu

world_size = 1  # matches the reference module's global


def _round_up(v, m):
    return (v + m - 1) // m * m


# ---------------------------------------------------------------------------
# Kernels
# ---------------------------------------------------------------------------
def _matmul_kernel(x_ref, w_ref, o_ref, acc_ref):
    # x_ref: (tm, tk) bf16   w_ref: (tk, tn) bf16 (pre-transposed)   o_ref: (tm, tn)
    @pl.when(pl.program_id(2) == 0)
    def _():
        acc_ref[...] = jnp.zeros_like(acc_ref)

    # Plain NN matmul: the weight was transposed once at init, so this feeds
    # the MXU directly with no per-step on-chip (XLU) transpose.
    acc_ref[...] += jnp.dot(x_ref[...], w_ref[...],
                            preferred_element_type=jnp.float32)

    @pl.when(pl.program_id(2) == pl.num_programs(2) - 1)
    def _():
        o_ref[...] = acc_ref[...].astype(o_ref.dtype)


def _matmul_bias_kernel(x_ref, w_ref, b_ref, o_ref, acc_ref):
    @pl.when(pl.program_id(2) == 0)
    def _():
        acc_ref[...] = jnp.zeros_like(acc_ref)

    acc_ref[...] += jnp.dot(x_ref[...], w_ref[...],
                            preferred_element_type=jnp.float32)

    @pl.when(pl.program_id(2) == pl.num_programs(2) - 1)
    def _():
        # Mirror the reference's `y(bf16) += bias`: cast to the output dtype
        # first, then add the f32 bias and round again (bit-faithful).
        y = acc_ref[...].astype(o_ref.dtype)
        o_ref[...] = (y.astype(jnp.float32) + b_ref[...]).astype(o_ref.dtype)


# ---------------------------------------------------------------------------
# Tiling plan
# ---------------------------------------------------------------------------
@functools.lru_cache(maxsize=1)
def _tile_config():
    """(tm, tn, tk, vmem_cap_bytes) per TPU generation.

    Output tiles sized so tm*tn/(tm+tn) clears each generation's MXU-roofline
    intensity requirement (>=240 v5e, >=650 v6e, >=620/TC v7x).  tk=512 keeps
    per-k-step MXU work well above the ~0.35us grid-step overhead and divides
    common transformer hidden sizes (no K padding).
    """
    try:
        kind = jax.devices()[0].device_kind.lower()
    except Exception:  # pragma: no cover - defensive fallback
        kind = ""
    if "v7" in kind or "7x" in kind:
        # Fastest chip, but only 64 MiB VMEM per TC -> cap the scoped limit.
        return 1024, 2048, 512, 48 << 20
    if "v6" in kind:
        # ~683 flops/byte, ~24 MiB double-buffered footprint; 128 MiB physical.
        return 1024, 2048, 512, 100 << 20
    if "v5p" in kind:
        return 1024, 2048, 512, 100 << 20
    if "v5" in kind:
        # v5e: ~341 flops/byte vs ~240 needed; ~8 MiB footprint.
        return 512, 1024, 512, 100 << 20
    # Unknown generation: conservative tiles and VMEM cap.
    return 512, 1024, 512, 48 << 20


@functools.lru_cache(maxsize=None)
def _plan_nk_tiles(n, k, tn_req=None, tk_req=None):
    """Deterministic (tn, tk) for logical (out_features, in_features).

    Used both at module init (to pre-transpose/pad the static weight once) and
    at call time, so the per-call weight pad is a no-op on the hot path.
    """
    _, tn0, tk0, _ = _tile_config()
    tn = min(tn_req or tn0, _round_up(n, 128))
    tk = min(tk_req or tk0, _round_up(k, 128))
    # Avoid large K-padding waste (wasted FLOPs + HBM traffic): if tk pads K by
    # more than ~12.5%, fall back to the largest 128-multiple (>=256) that
    # divides the 128-padded K.
    k128 = _round_up(k, 128)
    if k128 % tk != 0 and (_round_up(k128, tk) - k128) * 8 > k128:
        cand = ((tk // 128) - 1) * 128
        while cand >= 256:
            if k128 % cand == 0:
                tk = cand
                break
            cand -= 128
    return tn, tk


def _fit_vmem(tm, tn, tk, x_bytes, w_bytes, out_bytes, budget):
    """Shrink tiles to fit the VMEM budget: tk first, then tm, then tn."""
    def fp(tm_, tn_, tk_):
        return (2 * tm_ * tk_ * x_bytes          # x, double-buffered
                + 3 * tk_ * tn_ * w_bytes        # weight, up to Buffered(3)
                + 2 * tm_ * tn_ * out_bytes      # output, double-buffered
                + tm_ * tn_ * 4)                 # f32 accumulator
    while fp(tm, tn, tk) > budget and tk > 512 and tk % 256 == 0:
        tk //= 2
    while fp(tm, tn, tk) > budget and tm > 256:
        tm //= 2
    while fp(tm, tn, tk) > budget and tn > 256 and tn % 256 == 0:
        tn //= 2
    return tm, tn, tk, fp(tm, tn, tk)


# ---------------------------------------------------------------------------
# Wrapper
# ---------------------------------------------------------------------------
def row_parallel_linear(x, weight_t, *, bias=None, out_features=None,
                        tm=None, tn=None, tk=None):
    """y = x @ W.T (+ bias), where weight_t is W transposed to (K, N).

    weight_t may already be zero-padded (as done once at module init); logical
    K is taken from x, logical N from `out_features` (defaults to weight_t's).
    """
    *lead, k = x.shape
    kw, nw = weight_t.shape
    assert k <= kw, f"in_features mismatch: x has {k}, weight_t has {kw}"
    n = int(out_features) if out_features is not None else nw
    assert n <= nw

    m = 1
    for d in lead:
        m *= d
    x2d = x.reshape(m, k)

    tm0, _, _, vmem_cap = _tile_config()
    tn, tk = _plan_nk_tiles(n, k, tn, tk)
    tm = min(tm or tm0, _round_up(m, 16))

    out_dtype = x.dtype
    out_bytes = jnp.dtype(out_dtype).itemsize
    tm, tn, tk, footprint = _fit_vmem(tm, tn, tk, x.dtype.itemsize,
                                      weight_t.dtype.itemsize, out_bytes,
                                      vmem_cap - (8 << 20))

    mp = _round_up(m, tm)
    decode = (mp == tm)  # single M tile: pure weight-streaming loop
    if decode:
        # Keep >= 2 N tiles so both v7x TensorCores get work on decode shapes.
        while tn >= 256 and (tn // 2) % 128 == 0 and _round_up(n, tn) // tn < 2:
            tn //= 2

    np_ = _round_up(n, tn)
    kp = _round_up(k, tk)

    # Activation padding per call (cheap).  The weight is padded once at module
    # init; re-pad here only if a raw, unpadded weight was passed in.
    xp = x2d if (mp == m and kp == k) else jnp.pad(x2d, ((0, mp - m), (0, kp - k)))
    if kp > kw or np_ > nw:
        weight_t = jnp.pad(weight_t,
                           ((0, max(0, kp - kw)), (0, max(0, np_ - nw))))

    grid = (mp // tm, np_ // tn, kp // tk)

    cost = pl.CostEstimate(
        flops=2 * m * n * k,
        transcendentals=0,
        bytes_accessed=(m * k * x.dtype.itemsize
                        + k * n * weight_t.dtype.itemsize
                        + m * n * out_bytes),
    )
    cparams = pltpu.CompilerParams(
        dimension_semantics=("parallel", "parallel", "arbitrary"),
        vmem_limit_bytes=int(min(vmem_cap, max(32 << 20, footprint + footprint // 2))),
    )

    x_spec = pl.BlockSpec((tm, tk), lambda i, j, kk: (i, kk))
    w_index = lambda i, j, kk: (kk, j)
    w_spec = pl.BlockSpec((tk, tn), w_index)
    if decode and (np_ // tn) * (kp // tk) >= 3:
        # Decode: the weight is the only streamed operand -> deeper buffering
        # keeps the HBM weight stream back-to-back.
        try:
            w_spec = pl.BlockSpec((tk, tn), w_index, pipeline_mode=pl.Buffered(3))
        except TypeError:  # older jax without pipeline_mode
            w_spec = pl.BlockSpec((tk, tn), w_index)
    o_spec = pl.BlockSpec((tm, tn), lambda i, j, kk: (i, j))
    scratch = [pltpu.VMEM((tm, tn), jnp.float32)]

    if bias is None:
        out = pl.pallas_call(
            _matmul_kernel,
            out_shape=jax.ShapeDtypeStruct((mp, np_), out_dtype),
            grid=grid,
            in_specs=[x_spec, w_spec],
            out_specs=o_spec,
            scratch_shapes=scratch,
            compiler_params=cparams,
            cost_estimate=cost,
        )(xp, weight_t)
    else:
        b2d = bias.astype(jnp.float32).reshape(1, -1)
        bp = b2d if b2d.shape[1] == np_ else jnp.pad(
            b2d, ((0, 0), (0, np_ - b2d.shape[1])))
        b_spec = pl.BlockSpec((1, tn), lambda i, j, kk: (0, j))
        out = pl.pallas_call(
            _matmul_bias_kernel,
            out_shape=jax.ShapeDtypeStruct((mp, np_), out_dtype),
            grid=grid,
            in_specs=[x_spec, w_spec, b_spec],
            out_specs=o_spec,
            scratch_shapes=scratch,
            compiler_params=cparams,
            cost_estimate=cost,
        )(xp, weight_t, bp)

    out = out[:m, :n]
    # TODO(synk): for world_size > 1 the partial products would be all-reduced
    # across devices (jax.lax.psum / remote-DMA ring); world_size == 1 here.
    return out.reshape(*lead, n)


# ---------------------------------------------------------------------------
# Module mirror
# ---------------------------------------------------------------------------
class RowParallelLinear:
    """JAX/Pallas mirror of the PyTorch RowParallelLinear (bf16, no quant)."""

    def __init__(self, in_features, out_features, bias=False, dtype=jnp.bfloat16,
                 key=None):
        assert in_features % world_size == 0, (
            f"Input features must be divisible by world size (world_size={world_size})")
        self.part_in_features = in_features // world_size
        self.out_features = out_features
        if key is None:
            key = jax.random.PRNGKey(0)
        wkey, bkey = jax.random.split(key)
        # Deterministic synthetic init (nn.Parameter(torch.empty(...)) is
        # uninitialized in the reference, so any deterministic init is valid).
        bound = 1.0 / (self.part_in_features ** 0.5)
        self.weight = (
            jax.random.uniform(wkey, (out_features, self.part_in_features),
                               minval=-bound, maxval=bound, dtype=jnp.float32)
            .astype(dtype)
        )
        self.bias = (
            jax.random.uniform(bkey, (out_features,), minval=-bound,
                               maxval=bound, dtype=jnp.float32)
            if bias else None
        )
        # One-time (static parameter) transpose to (K, N) + zero-pad to the
        # kernel's tile plan, so the hot path does no per-call weight pad or
        # on-chip transpose.
        tn_i, tk_i = _plan_nk_tiles(out_features, self.part_in_features)
        kp = _round_up(self.part_in_features, tk_i)
        np_ = _round_up(out_features, tn_i)
        wt = self.weight.T
        if wt.shape != (kp, np_):
            wt = jnp.pad(wt, ((0, kp - self.part_in_features),
                              (0, np_ - out_features)))
        self._weight_t = wt

    def __call__(self, x):
        return row_parallel_linear(x, self._weight_t, bias=self.bias,
                                   out_features=self.out_features)


# ---------------------------------------------------------------------------
# Self-test
# ---------------------------------------------------------------------------
if __name__ == "__main__":
    key = jax.random.PRNGKey(0)
    kx, kw, kx2 = jax.random.split(key, 3)

    # --- small default shapes: bias=False (module default) ------------------
    batch, seq, in_features, out_features = 2, 8, 32, 32
    x = jax.random.normal(kx, (batch, seq, in_features),
                          dtype=jnp.float32).astype(jnp.bfloat16)

    layer = RowParallelLinear(in_features, out_features, bias=False, key=kw)
    y = jax.block_until_ready(layer(x))
    y_ref = jnp.dot(x.astype(jnp.float32),
                    layer.weight.astype(jnp.float32).T).astype(jnp.bfloat16)
    assert y.shape == (batch, seq, out_features)
    assert y.dtype == jnp.bfloat16
    assert jnp.allclose(y.astype(jnp.float32), y_ref.astype(jnp.float32),
                        atol=1e-2, rtol=1e-2)

    # --- bias path (kept bf16, matching the in-place `y += bias`) -----------
    layer_b = RowParallelLinear(in_features, out_features, bias=True, key=kw)
    yb = jax.block_until_ready(layer_b(x))
    yb_f32 = jnp.dot(x.astype(jnp.float32), layer_b.weight.astype(jnp.float32).T)
    yb_ref = (yb_f32.astype(jnp.bfloat16).astype(jnp.float32)
              + layer_b.bias).astype(jnp.bfloat16)
    assert yb.shape == (batch, seq, out_features)
    assert yb.dtype == jnp.bfloat16
    assert jnp.allclose(yb.astype(jnp.float32), yb_ref.astype(jnp.float32),
                        atol=1e-2, rtol=1e-2)

    # --- non-multiple shapes: exercises K-grid > 1, N padding, decode path --
    in2, out2, seq2 = 768, 192, 24
    x2 = jax.random.normal(kx2, (batch, seq2, in2),
                           dtype=jnp.float32).astype(jnp.bfloat16)
    layer2 = RowParallelLinear(in2, out2, bias=True, key=kw)
    y2 = jax.block_until_ready(layer2(x2))
    y2_f32 = jnp.dot(x2.astype(jnp.float32), layer2.weight.astype(jnp.float32).T)
    y2_ref = (y2_f32.astype(jnp.bfloat16).astype(jnp.float32)
              + layer2.bias).astype(jnp.bfloat16)
    assert y2.shape == (batch, seq2, out2)
    assert y2.dtype == jnp.bfloat16
    assert jnp.allclose(y2.astype(jnp.float32), y2_ref.astype(jnp.float32),
                        atol=2e-1, rtol=2e-2)

    print("KERNEL_OK")
</pallas_src>

<mosaic_0001>
module attributes {stable_mosaic.version = 11 : i64} {
  func.func @_matmul_kernel(%arg0: i32, %arg1: i32, %arg2: i32, %arg3: memref<16x128xbf16, #tpu.memory_space<vmem>>, %arg4: memref<128x128xbf16, #tpu.memory_space<vmem>>, %arg5: memref<16x128xbf16, #tpu.memory_space<vmem>>, %arg6: memref<16x128xf32, #tpu.memory_space<vmem>>) attributes {dimension_semantics = [#tpu.dimension_semantics<parallel>, #tpu.dimension_semantics<parallel>, #tpu.dimension_semantics<arbitrary>], iteration_bounds = array<i64: 1, 1, 1>, scalar_prefetch = 0 : i64, scratch_operands = 1 : i64, tpu.core_type = #tpu.core_type<tc>, window_params = [{transform_indices = @transform_0, window_bounds = array<i64: 16, 128>}, {transform_indices = @transform_1, window_bounds = array<i64: 128, 128>}, {transform_indices = @transform_2, window_bounds = array<i64: 16, 128>}]} {
    %c0_i32 = arith.constant 0 : i32
    %0 = arith.cmpi eq, %arg2, %c0_i32 : i32
    %1 = arith.extui %0 : i1 to i32
    %c0_i32_0 = arith.constant 0 : i32
    %2 = arith.cmpi ne, %1, %c0_i32_0 : i32
    scf.if %2 {
      %cst_10 = arith.constant 0.000000e+00 : f32
      %12 = vector.broadcast %cst_10 : f32 to vector<16x128xf32>
      %c0_11 = arith.constant 0 : index
      %c0_12 = arith.constant 0 : index
      %13 = vector.load %arg6[%c0_11, %c0_12] : memref<16x128xf32, #tpu.memory_space<vmem>>, vector<16x128xf32>
      tpu.vector_store %arg6[%c0_11, %c0_12], %12 {strides = array<i32>} : memref<16x128xf32, #tpu.memory_space<vmem>>, vector<16x128xf32>,
    } else {
    }
    %c0 = arith.constant 0 : index
    %c0_1 = arith.constant 0 : index
    %3 = vector.load %arg6[%c0, %c0_1] : memref<16x128xf32, #tpu.memory_space<vmem>>, vector<16x128xf32>
    %c0_2 = arith.constant 0 : index
    %c0_3 = arith.constant 0 : index
    %4 = vector.load %arg3[%c0_2, %c0_3] : memref<16x128xbf16, #tpu.memory_space<vmem>>, vector<16x128xbf16>
    %c0_4 = arith.constant 0 : index
    %c0_5 = arith.constant 0 : index
    %5 = vector.load %arg4[%c0_4, %c0_5] : memref<128x128xbf16, #tpu.memory_space<vmem>>, vector<128x128xbf16>
    %cst = arith.constant dense<0.000000e+00> : vector<16x128xf32>
    %6 = tpu.matmul %4, %5, %cst {dimension_numbers = #tpu.dot_dimension_numbers<[1], [0], [0], [1], [0, 0, 1, 1], [], []>} : vector<16x128xbf16>, vector<128x128xbf16>, vector<16x128xf32> -> vector<16x128xf32>
    %7 = arith.addf %3, %6 : vector<16x128xf32>
    %c0_6 = arith.constant 0 : index
    %c0_7 = arith.constant 0 : index
    %8 = vector.load %arg6[%c0_6, %c0_7] : memref<16x128xf32, #tpu.memory_space<vmem>>, vector<16x128xf32>
    tpu.vector_store %arg6[%c0_6, %c0_7], %7 {strides = array<i32>} : memref<16x128xf32, #tpu.memory_space<vmem>>, vector<16x128xf32>,
    %c0_i32_8 = arith.constant 0 : i32
    %9 = arith.cmpi eq, %arg2, %c0_i32_8 : i32
    %10 = arith.extui %9 : i1 to i32
    %c0_i32_9 = arith.constant 0 : i32
    %11 = arith.cmpi ne, %10, %c0_i32_9 : i32
    scf.if %11 {
      %c0_10 = arith.constant 0 : index
      %c0_11 = arith.constant 0 : index
      %12 = vector.load %arg6[%c0_10, %c0_11] : memref<16x128xf32, #tpu.memory_space<vmem>>, vector<16x128xf32>
      %13 = arith.truncf %12 : vector<16x128xf32> to vector<16x128xbf16>
      %c0_12 = arith.constant 0 : index
      %c0_13 = arith.constant 0 : index
      %14 = vector.load %arg5[%c0_12, %c0_13] : memref<16x128xbf16, #tpu.memory_space<vmem>>, vector<16x128xbf16>
      tpu.vector_store %arg5[%c0_12, %c0_13], %13 {strides = array<i32>} : memref<16x128xbf16, #tpu.memory_space<vmem>>, vector<16x128xbf16>,
    } else {
    }
    return
  }
  func.func @transform_0(%arg0: i32, %arg1: i32, %arg2: i32) -> (i32, i32) {
    %c0_i32 = arith.constant 0 : i32
    return %arg0, %arg2 : i32, i32
  }
  func.func @transform_1(%arg0: i32, %arg1: i32, %arg2: i32) -> (i32, i32) {
    %c0_i32 = arith.constant 0 : i32
    return %arg2, %arg1 : i32, i32
  }
  func.func @transform_2(%arg0: i32, %arg1: i32, %arg2: i32) -> (i32, i32) {
    %c0_i32 = arith.constant 0 : i32
    return %arg0, %arg1 : i32, i32
  }
}

</mosaic_0001>

<bundles_post_ra>
// kernel: tpu_custom_call.1
= control target key start
LH: loop header
LB: loop body
LE: loop exit
PB: predicated region body
PF: predicated region fallthrough
CT: control target
= control target key end

     0   :  { %7 = vsyncpa [#allocation4], 0  ;;  %s368_s0 = inlined_call_operand.hbm [shape: bf16[16,128], index: 0, kind: input, shape index: {}]   ;;  %s369_s1 = inlined_call_operand.hbm [shape: bf16[128,128], index: 1, kind: input, shape index: {}]   ;;  %s370_s2 = inlined_call_operand.hbm [shape: bf16[16,128], index: 2, kind: output, shape index: {}]  }
   0x1   :  { %8 = vsyncpa [#allocation7], 0 }
   0x2   :  { %9 = vsyncpa [#allocation5], 0  ;;  %s328_s9 = smov [#allocation3]  }
   0x3   :  { %s15_s10 = sshll.u32 %s328_s9, 4  ;;  %s16_s10 = int_to_ptr.vmem [resolvable:$true] %s15_s10 }
   0x4   :  { %s270_s11 = scalar_lea.vmem %s16_s10, 128  ;;  %p275_p1 = scmp.lt.s32.totalorder %s16_s10, %s16_s10 }
   0x5   :  { %p271_p0 = scmp.ne.s32.totalorder %s16_s10, %s270_s11  ;;  %p276_p2 = scmp.lt.s32.totalorder %s270_s11, %s270_s11 }
   0x7   :  { %p277_p3 = por %p276_p2, %p275_p1 }
   0x9   :  { %p278_p4 = pnand %p277_p3, %p271_p0 }
   0xb   :  { %281 = shalt.err (!%p278_p4)
}
   0xc   :  { %s329_s12 = smov 64   ;;  %s330_s13 = smov 4  }
   0xd   :  { %21 = dma.hbm_to_vmem [thread:$0]  %s368_s0, 128, %s16_s10, [#allocation4], %s329_s12, %s329_s12, %s330_s13  }
   0xe   :  { %s331_s16 = smov [#allocation6]  }
   0xf   :  { %s27_s17 = sshll.u32 %s331_s16, 4  ;;  %s28_s17 = int_to_ptr.vmem [resolvable:$true] %s27_s17 }
  0x10   :  { %s290_s18 = scalar_lea.vmem %s28_s17, 1024  ;;  %p295_p6 = scmp.lt.s32.totalorder %s28_s17, %s28_s17 }
  0x11   :  { %p291_p5 = scmp.ne.s32.totalorder %s28_s17, %s290_s18  ;;  %p296_p7 = scmp.lt.s32.totalorder %s290_s18, %s290_s18 }
  0x13   :  { %p297_p8 = por %p296_p7, %p295_p6 }
  0x15   :  { %p298_p9 = pnand %p297_p8, %p291_p5 }
  0x17   :  { %301 = shalt.err (!%p298_p9)
}
  0x18   :  { %33 = dma.hbm_to_vmem [thread:$0]  %s369_s1, 1024, %s28_s17, [#allocation7], %s329_s12, %s329_s12, %s330_s13  }
  0x19   :  { %322 = dma.done.wait [#allocation4], 128  }
  0x1a   :  { %323 = vsyncadd [#allocation4], 4294967168 }
  0x1b   :  { %324 = dma.done.wait [#allocation7], 1024  }
  0x1c   :  { %325 = vsyncadd [#allocation7], 4294966272  ;;  %v332_v0 = vmov 0.0   ;;  %vm333_vm0 = vmmov 0   ;;  %v253_v1 = vld [vmem:[#allocation6 + $0x38] sm:$0xff]   ;;  %v254_v2 = vld [vmem:[#allocation6 + $0x30] sm:$0xff]  }
  0x1d   :  { %226 = vmatprep.subr.bf16.mxu0 %v332_v0  ;;  %242 = vmatprep.mubr.msk.bf16.mxu0 %vm333_vm0, %v332_v0  ;;  %v255_v3 = vld [vmem:[#allocation6 + $0x28] sm:$0xff]   ;;  %v256_v4 = vld [vmem:[#allocation6 + $0x20] sm:$0xff]   ;;  %v257_v5 = vld [vmem:[#allocation6 + $0x18] sm:$0xff]   ;;  %s334_s0 = smov [#allocation8]  }
  0x1e   :  { %227 = vmatpush3.bf16.msra.mxu0 %v253_v1  ;;  %v258_v6 = vld [vmem:[#allocation6 + $0x10] sm:$0xff]   ;;  %v259_v7 = vld [vmem:[#allocation6 + $0x8] sm:$0xff]   ;;  %v260_v8 = vld [vmem:[#allocation6] sm:$0xff]   ;;  %s186_s1 = sshll.u32 %s334_s0, 4  ;;  %s187_s1 = int_to_ptr.vmem [resolvable:$true] %s186_s1 }
  0x1f   :  { %228 = vmatprep.subr.bf16.mxu0 %v332_v0  ;;  %v261_v9 = vld [vmem:[#allocation3] sm:$0xff]   ;;  %s302_s21 = scalar_lea.vmem %s187_s1, 128  ;;  %p307_p11 = scmp.lt.s32.totalorder %s187_s1, %s187_s1 }
  0x20   :  { %p303_p10 = scmp.ne.s32.totalorder %s187_s1, %s302_s21  ;;  %p308_p12 = scmp.lt.s32.totalorder %s302_s21, %s302_s21 }
  0x22   :  { %229 = vmatpush3.bf16.msra.mxu0 %v254_v2  ;;  %p309_p13 = por %p308_p12, %p307_p11 }
  0x23   :  { %230 = vmatprep.subr.bf16.mxu0 %v332_v0 }
  0x24   :  { %p310_p0 = pnand %p309_p13, %p303_p10 }
  0x26   :  { %231 = vmatpush3.bf16.msra.mxu0 %v255_v3 }
  0x27   :  { %232 = vmatprep.subr.bf16.mxu0 %v332_v0 }
  0x2a   :  { %233 = vmatpush3.bf16.msra.mxu0 %v256_v4 }
  0x2b   :  { %234 = vmatprep.subr.bf16.mxu0 %v332_v0 }
  0x2e   :  { %235 = vmatpush3.bf16.msra.mxu0 %v257_v5 }
  0x2f   :  { %236 = vmatprep.subr.bf16.mxu0 %v332_v0 }
  0x32   :  { %237 = vmatpush3.bf16.msra.mxu0 %v258_v6 }
  0x33   :  { %238 = vmatprep.subr.bf16.mxu0 %v332_v0 }
  0x36   :  { %239 = vmatpush3.bf16.msra.mxu0 %v259_v7 }
  0x37   :  { %240 = vmatprep.subr.bf16.mxu0 %v332_v0 }
  0x3a   :  { %241 = vmatpush3.bf16.msra.mxu0 %v260_v8 }
  0x3d   :  { %243 = vmatmul.mubr.bf16.vlgmr.msra.gmra.mxu0 %v261_v9 }
  0xfd   :  { %v155_v10 = vpop.f32.mrf.mxu0 }
  0xff   :  { %v244_v11 = vpop.f32.mrf.mxu0 }
 0x101   :  { %v158_v12 = vpop.f32.mrf.mxu0 }
 0x102   :  { %v215_v13 = vpack.c.bf16 %v158_v12, %v155_v10 }
 0x103   :  { %v245_v14 = vpop.f32.mrf.mxu0 }
 0x104   :  { %216 = vst [vmem:[#allocation8] sm:$0xff] %v215_v13  }
 0x105   :  { %313 = shalt.err (!%p310_p0)
}
 0x106   :  { %192 = dma.vmem_to_hbm [thread:$0]  %s187_s1, 128, %s370_s2, [#allocation5], %s329_s12, %s329_s12, %s330_s13  }
 0x107   :  { %326 = dma.done.wait [#allocation5], 128  }
 0x108   :  { %327 = vsyncadd [#allocation5], 4294967168 }
 0x109   :  { %196 = vsyncpa [#allocation4], 1 }
 0x10a   :  { %197 = vsyncpa [#allocation7], 1 }
 0x10b   :  { %198 = vsyncpa [#allocation5], 1 }

</bundles_post_ra>
